<compile_context>
chip_gen: v5e
topology: v5e:2x2
jax: 0.10.0
libtpu: 0.0.40
codegen_flags: <defaults>
</compile_context>

<pallas_src>
import functools

import jax
import jax.numpy as jnp
from jax import lax
from jax.experimental import pallas as pl
from jax.experimental.pallas import tpu as pltpu


_LANE = 128
# Keep the K loop alive even when VMEM would allow one giant tile: 32768 lanes
# per step is already a multi-MiB contiguous DMA for any realistic N.
_ABS_MAX_TK = 32768


def _cdiv(a: int, b: int) -> int:
    return -(-a // b)


def _round_up(x: int, m: int) -> int:
    return _cdiv(x, m) * m


def _round_down(x: int, m: int) -> int:
    return (x // m) * m


@functools.lru_cache(maxsize=1)
def _vmem_capacity_bytes() -> int:
    """Physical VMEM per TensorCore (64 MiB v7x, 128 MiB v5e/v6e)."""
    try:
        return int(pltpu.get_tpu_info().vmem_capacity_bytes)
    except Exception:
        # Conservative fallback: assume the smallest (v7x) VMEM.
        return 64 << 20


def _plan(n: int, k: int, itemsize: int):
    """Pick (tk, num_partials, tiles_per_partial, padded_k, vmem_limit)."""
    cap = _vmem_capacity_bytes()
    k_pad = max(_round_up(k, _LANE), _LANE)

    # ~40% of physical VMEM for the double-buffered (N, TK) input tile; the
    # rest is headroom for the (N, N) accumulator blocks and compiler scratch.
    # This automatically shrinks TK on v7x relative to v5e/v6e.
    input_budget = max(int(cap * 0.4), 2 * n * _LANE * itemsize)
    tk = _round_down(input_budget // (2 * n * itemsize), _LANE)
    tk = max(_LANE, min(tk, _ABS_MAX_TK, k_pad))

    num_tiles = _cdiv(k_pad, tk)
    # Split the K reduction into 2 partial grams when there is more than one
    # K tile so v7x's second TensorCore is not idle.  On 1-TC chips the
    # parallel axis just iterates sequentially (tiny extra cost: one more
    # (N, N) accumulator writeback).
    num_partials = 2 if num_tiles >= 2 else 1
    tiles_per_partial = _cdiv(num_tiles, num_partials)
    k_final = num_partials * tiles_per_partial * tk

    in_bytes = 2 * n * tk * itemsize        # double-buffered (N, TK) input
    out_bytes = 2 * n * n * 4               # (N, N) f32 accumulator block(s)
    vmem_limit = max(32 << 20,
                     min(int(cap * 0.9), in_bytes + out_bytes + (8 << 20)))
    return tk, num_partials, tiles_per_partial, k_final, vmem_limit


def _to_matrix(img):
    b, c, h, w = img.shape
    return img.reshape(b * c, h * w)


# ---------------------------------------------------------------------------
# Kernel
# ---------------------------------------------------------------------------

def _gram_partial_kernel(m_ref, gram_ref):
    """Accumulate a partial M @ M.T over this partial's K tiles."""
    k = pl.program_id(1)

    @pl.when(k == 0)
    def _():
        gram_ref[...] = jnp.zeros_like(gram_ref)

    m = m_ref[...]
    # Contract dim 1 of M with dim 1 of M == M @ M.T (no explicit transpose of
    # the large (N, TK) operand is requested).
    gram_ref[...] += lax.dot_general(
        m, m,
        dimension_numbers=(((1,), (1,)), ((), ())),
        preferred_element_type=jnp.float32,
    )


# ---------------------------------------------------------------------------
# Pallas wrappers
# ---------------------------------------------------------------------------

def _gram_call(m):
    """Un-normalized gram matrix M @ M.T via the K-tiled Pallas kernel."""
    n, k = m.shape
    itemsize = jnp.dtype(m.dtype).itemsize
    tk, p, tpp, k_final, vmem_limit = _plan(n, k, itemsize)

    # Guard against silently dropping trailing K columns.
    assert k_final == p * tpp * tk and k_final >= k and tk % _LANE == 0

    if k_final != k:
        # Zero columns are an exact no-op for M @ M.T.
        m = jnp.pad(m, ((0, 0), (0, k_final - k)))

    cost = pl.CostEstimate(
        flops=2 * n * n * k_final,
        transcendentals=0,
        bytes_accessed=n * k_final * itemsize + p * n * n * 4,
    )

    partials = pl.pallas_call(
        _gram_partial_kernel,
        out_shape=jax.ShapeDtypeStruct((p, n, n), jnp.float32),
        grid=(p, tpp),
        in_specs=[pl.BlockSpec((n, tk), lambda pp, kk: (0, pp * tpp + kk))],
        out_specs=pl.BlockSpec((None, n, n), lambda pp, kk: (pp, 0, 0)),
        compiler_params=pltpu.CompilerParams(
            dimension_semantics=("parallel", "arbitrary"),
            vmem_limit_bytes=vmem_limit,
        ),
        cost_estimate=cost,
    )(m)

    # Tiny (N, N) epilogue: combine the per-core partial grams.
    return jnp.sum(partials, axis=0)


@jax.jit
def _gram_pallas(m):
    return _gram_call(m)


@jax.jit
def _style_pallas(m, target_gram):
    gram_gen = _gram_call(m)
    diff = gram_gen - target_gram
    loss = jnp.mean(diff * diff)
    return gram_gen, loss


def gram_matrix(img):
    """Pallas gram matrix of an NCHW image (== torch gram_maxtrix)."""
    return _gram_pallas(_to_matrix(img))


class Style:
    """JAX/Pallas port of the PyTorch `style` module."""

    def __init__(self, target_img):
        # target gram computed once (== __init__ + .detach() in torch)
        self.target_gram = gram_matrix(target_img)
        self.loss = None
        self.gram_gen = None

    def forward(self, gen_img):
        gram_gen, loss = _style_pallas(_to_matrix(gen_img), self.target_gram)
        self.gram_gen = gram_gen
        self.loss = loss
        return gen_img  # pass-through, exactly like the torch module

    __call__ = forward


# ---------------------------------------------------------------------------
# Main
# ---------------------------------------------------------------------------

if __name__ == "__main__":
    import numpy as np

    def gram_ref_fn(img):
        a = np.asarray(img, dtype=np.float64)
        mm = a.reshape(a.shape[0] * a.shape[1], a.shape[2] * a.shape[3])
        return mm @ mm.T

    def run_case(case_key, shape, gram_rtol, gram_atol, loss_rtol, loss_atol):
        k1, k2 = jax.random.split(case_key)
        target_img = jax.random.normal(k1, shape, dtype=jnp.float32)
        gen_img = jax.random.normal(k2, shape, dtype=jnp.float32)

        model = Style(target_img)
        out = model(gen_img)

        out = jax.block_until_ready(out)
        loss = float(jax.block_until_ready(model.loss))

        tgt_ref = gram_ref_fn(target_img)
        gen_ref = gram_ref_fn(gen_img)
        loss_ref = float(np.mean((gen_ref - tgt_ref) ** 2))

        assert np.array_equal(np.asarray(out), np.asarray(gen_img))
        np.testing.assert_allclose(np.asarray(model.target_gram), tgt_ref,
                                   rtol=gram_rtol, atol=gram_atol)
        np.testing.assert_allclose(np.asarray(model.gram_gen), gen_ref,
                                   rtol=gram_rtol, atol=gram_atol)
        assert abs(loss - loss_ref) <= loss_atol + loss_rtol * abs(loss_ref), (
            loss, loss_ref)

    key = jax.random.PRNGKey(0)
    k1, k2, k3 = jax.random.split(key, 3)

    # Spec shape (B=2, C=4, H=W=16): single K tile, single partial.
    run_case(k1, (2, 4, 16, 16),
             gram_rtol=1e-4, gram_atol=1e-2, loss_rtol=1e-3, loss_atol=1e-2)

    # Ragged K (H=W=10 -> K=100): exercises the zero-padding path.
    run_case(k2, (2, 4, 10, 10),
             gram_rtol=1e-4, gram_atol=1e-2, loss_rtol=1e-3, loss_atol=1e-2)

    # Large K (H=256, W=512 -> K=131072): multi-step K accumulation plus the
    # 2-way "parallel" partial split (4 tiles of TK=32768, 2 per partial).
    run_case(k3, (2, 4, 256, 512),
             gram_rtol=1e-3, gram_atol=32.0, loss_rtol=5e-2, loss_atol=1.0)

    print("KERNEL_OK")
</pallas_src>

<mosaic_0001>
module attributes {stable_mosaic.version = 11 : i64} {
  func.func @_gram_partial_kernel(%arg0: i32, %arg1: i32, %arg2: memref<8x256xf32, #tpu.memory_space<vmem>>, %arg3: memref<1x8x8xf32, #tpu.memory_space<vmem>>) attributes {dimension_semantics = [#tpu.dimension_semantics<parallel>, #tpu.dimension_semantics<arbitrary>], iteration_bounds = array<i64: 1, 1>, scalar_prefetch = 0 : i64, scratch_operands = 0 : i64, tpu.core_type = #tpu.core_type<tc>, window_params = [{transform_indices = @transform_0, window_bounds = array<i64: 8, 256>}, {transform_indices = @transform_1, window_bounds = array<i64: 1, 8, 8>}]} {
    %c0_i32 = arith.constant 0 : i32
    %0 = arith.cmpi eq, %arg1, %c0_i32 : i32
    %1 = arith.extui %0 : i1 to i32
    %c0_i32_0 = arith.constant 0 : i32
    %2 = arith.cmpi ne, %1, %c0_i32_0 : i32
    scf.if %2 {
      %cst_8 = arith.constant 0.000000e+00 : f32
      %11 = vector.broadcast %cst_8 : f32 to vector<8x8xf32>
      %c0_9 = arith.constant 0 : index
      %c0_10 = arith.constant 0 : index
      %c0_11 = arith.constant 0 : index
      %12 = vector.load %arg3[%c0_9, %c0_10, %c0_11] : memref<1x8x8xf32, #tpu.memory_space<vmem>>, vector<1x8x8xf32>
      %13 = vector.shape_cast %12 : vector<1x8x8xf32> to vector<8x8xf32>
      %14 = vector.shape_cast %11 : vector<8x8xf32> to vector<1x8x8xf32>
      tpu.vector_store %arg3[%c0_9, %c0_10, %c0_11], %14 {strides = array<i32>} : memref<1x8x8xf32, #tpu.memory_space<vmem>>, vector<1x8x8xf32>,
    } else {
    }
    %c0 = arith.constant 0 : index
    %c0_1 = arith.constant 0 : index
    %3 = vector.load %arg2[%c0, %c0_1] : memref<8x256xf32, #tpu.memory_space<vmem>>, vector<8x256xf32>
    %c0_2 = arith.constant 0 : index
    %c0_3 = arith.constant 0 : index
    %c0_4 = arith.constant 0 : index
    %4 = vector.load %arg3[%c0_2, %c0_3, %c0_4] : memref<1x8x8xf32, #tpu.memory_space<vmem>>, vector<1x8x8xf32>
    %5 = vector.shape_cast %4 : vector<1x8x8xf32> to vector<8x8xf32>
    %cst = arith.constant dense<0.000000e+00> : vector<8x8xf32>
    %6 = tpu.matmul %3, %3, %cst {dimension_numbers = #tpu.dot_dimension_numbers<[1], [1], [0], [0], [0, 0, 1, 0], [], []>} : vector<8x256xf32>, vector<8x256xf32>, vector<8x8xf32> -> vector<8x8xf32>
    %7 = arith.addf %5, %6 : vector<8x8xf32>
    %c0_5 = arith.constant 0 : index
    %c0_6 = arith.constant 0 : index
    %c0_7 = arith.constant 0 : index
    %8 = vector.load %arg3[%c0_5, %c0_6, %c0_7] : memref<1x8x8xf32, #tpu.memory_space<vmem>>, vector<1x8x8xf32>
    %9 = vector.shape_cast %8 : vector<1x8x8xf32> to vector<8x8xf32>
    %10 = vector.shape_cast %7 : vector<8x8xf32> to vector<1x8x8xf32>
    tpu.vector_store %arg3[%c0_5, %c0_6, %c0_7], %10 {strides = array<i32>} : memref<1x8x8xf32, #tpu.memory_space<vmem>>, vector<1x8x8xf32>,
    return
  }
  func.func @transform_0(%arg0: i32, %arg1: i32) -> (i32, i32) {
    %c1_i32 = arith.constant 1 : i32
    %0 = arith.muli %arg0, %c1_i32 : i32
    %1 = arith.addi %0, %arg1 : i32
    %c0_i32 = arith.constant 0 : i32
    %c0_i32_0 = arith.constant 0 : i32
    return %c0_i32, %1 : i32, i32
  }
  func.func @transform_1(%arg0: i32, %arg1: i32) -> (i32, i32, i32) {
    %c0_i32 = arith.constant 0 : i32
    %c0_i32_0 = arith.constant 0 : i32
    %c0_i32_1 = arith.constant 0 : i32
    return %arg0, %c0_i32, %c0_i32_0 : i32, i32, i32
  }
}

</mosaic_0001>

<bundles_post_ra>
// kernel: _gram_pallas.1
= control target key start
LH: loop header
LB: loop body
LE: loop exit
PB: predicated region body
PF: predicated region fallthrough
CT: control target
= control target key end

     0   :  { %6 = vsyncpa [#allocation3], 0  ;;  %s174_s0 = inlined_call_operand.hbm [shape: f32[8,256], index: 0, kind: input, shape index: {}]   ;;  %s175_s1 = inlined_call_operand.hbm [shape: f32[1,8,8], index: 1, kind: output, shape index: {}]  }
   0x1   :  { %7 = vsyncpa [#allocation4], 0  ;;  %s17_s8 = sshll.u32 %s174_s0, 4  ;;  %s153_s9 = smov [#allocation2]   ;;  %s18_s8 = int_to_ptr.hbm [resolvable:$true] %s17_s8 }
   0x2   :  { %s19_s10 = sshll.u32 %s153_s9, 4  ;;  %s20_s10 = int_to_ptr.vmem [resolvable:$true] %s19_s10 }
   0x3   :  { %22 = dma.hbm_to_vmem [thread:$0]  %s18_s8, 256, %s20_s10, [#allocation3]  }
   0x4   :  { %149 = dma.done.wait [#allocation3], 256  }
   0x5   :  { %150 = vsyncadd [#allocation3], 4294967040  ;;  %vm33_vm0 = vcmask 64512   ;;  %v154_v0 = vmov 0.0   ;;  %v35_v1 = vld [vmem:[#allocation2] sm:$0xff]  ;;  %v36_v2 = vld [vmem:[#allocation2 + $0x8] sm:$0xff] }
   0x6   :  { %34 = vst.msk [vmem:[#allocation5] sm:$0xff] %vm33_vm0, %v154_v0  ;;  %53 = vmatpush.xpose.msra.mxu0 %v35_v1  ;;  %73 = vmatpush.xpose.msra.mxu1 %v36_v2  ;;  %s155_s0 = smov [#allocation5]   ;;  %s88_s14 = sshll.u32 %s175_s1, 4  ;;  %s89_s14 = int_to_ptr.hbm [resolvable:$true] %s88_s14 }
   0x7   :  { %s86_s11 = sshll.u32 %s155_s0, 4  ;;  %s87_s11 = int_to_ptr.vmem [resolvable:$true] %s86_s11 }
   0x9   :  { %54 = vmatmul.f32.vlgmr.msra.gmra.mxu0 %v35_v1  ;;  %74 = vmatmul.f32.vlgmr.msra.gmra.mxu1 %v36_v2 }
   0xd   :  { %v37_v4 = vld [vmem:[#allocation5] sm:$0xff] }
  0x86   :  { %v55_v3 = vpop.f32.mrf.mxu0  ;;  %v75_v5 = vpop.f32.mrf.mxu1 }
  0x87   :  { %v76_v6 = vadd.f32 %v75_v5, %v55_v3 }
  0x89   :  { %v78_v7 = vadd.f32 %v76_v6, %v37_v4 }
  0x8b   :  { %80 = vst.msk [vmem:[#allocation5] sm:$0xff] %vm33_vm0, %v78_v7 }
  0x8c   :  { %91 = dma.vmem_to_hbm [thread:$0]  %s87_s11, 128, %s89_s14, [#allocation4]  }
  0x8d   :  { %151 = dma.done.wait [#allocation4], 128  }
  0x8e   :  { %152 = vsyncadd [#allocation4], 4294967168 }
  0x8f   :  { %96 = vsyncpa [#allocation3], 1 }
  0x90   :  { %97 = vsyncpa [#allocation4], 1 }

</bundles_post_ra>
